<compile_context>
chip_gen: v5e
topology: v5e:2x2
jax: 0.10.0
libtpu: 0.0.40
codegen_flags: <defaults>
</compile_context>

<pallas_src>
import functools

import jax
import jax.numpy as jnp
from jax.experimental import pallas as pl
from jax.experimental.pallas import tpu as pltpu

_LANES = 128
_GROUP = 4               # lane-chunks folded locally before touching scratch
_STATIC_GROUP_LIMIT = 8  # more groups than this -> lax.fori_loop, not unroll


def _round_up(x, m):
    return (x + m - 1) // m * m


def _vmem_limit_bytes():
    """Generation-aware scoped-VMEM limit (working set stays well below it)."""
    phys = 64 * 1024 * 1024
    try:
        info = pltpu.get_tpu_info()
        cap = getattr(info, "vmem_capacity_bytes", None)
        if cap:
            phys = int(cap)
    except Exception:
        pass
    # 3/4 of physical: ~48 MiB on v7x (64 MiB), ~96 MiB on v5e/v6e (128 MiB).
    return int(max(32 * 1024 * 1024, min(phys * 3 // 4, 100 * 1024 * 1024)))


def _make_kernel(*, tile_hw, hw_steps, hw_valid_last, inv_hw):
    """Build the kernel for fixed tiling.

    hw_valid_last: number of valid lanes in the last H*W block (1..tile_hw).
    inv_hw: 1 / (true H*W) so the mean is exact regardless of masking.
    """
    n_chunks = tile_hw // _LANES            # 128-lane chunks in a full block
    tail_full = hw_valid_last // _LANES     # full chunks in the last block
    tail_rem = hw_valid_last % _LANES       # masked lanes in the last block

    def _accum(x_ref, sum_acc, max_acc, n_full, tail_lanes):
        """Fold n_full full 128-lane chunks plus an optional masked tail chunk."""
        n_groups = n_full // _GROUP
        n_rest = n_full - n_groups * _GROUP

        def fold_group(base_lane):
            # Local partial sum/max over _GROUP chunks; scratch touched once.
            psum = None
            pmax = None
            for j in range(_GROUP):
                start = base_lane + j * _LANES
                if not isinstance(start, int):
                    start = pl.multiple_of(start, _LANES)
                ch = x_ref[:, pl.ds(start, _LANES)].astype(jnp.float32)
                psum = ch if psum is None else psum + ch
                pmax = ch if pmax is None else jnp.maximum(pmax, ch)
            sum_acc[...] += psum
            max_acc[...] = jnp.maximum(max_acc[...], pmax)

        if n_groups > _STATIC_GROUP_LIMIT:
            def body(g, carry):
                fold_group(g * (_GROUP * _LANES))
                return carry
            jax.lax.fori_loop(0, n_groups, body, 0, unroll=2)
        else:
            for g in range(n_groups):
                fold_group(g * _GROUP * _LANES)

        # Leftover full chunks + masked ragged tail (all static structure).
        psum = None
        pmax = None
        base_chunk = n_groups * _GROUP
        for j in range(n_rest):
            c = base_chunk + j
            ch = x_ref[:, c * _LANES:(c + 1) * _LANES].astype(jnp.float32)
            psum = ch if psum is None else psum + ch
            pmax = ch if pmax is None else jnp.maximum(pmax, ch)
        if tail_lanes:
            c = base_chunk + n_rest
            ch = x_ref[:, c * _LANES:(c + 1) * _LANES].astype(jnp.float32)
            lane = jax.lax.broadcasted_iota(jnp.int32, ch.shape, 1)
            valid = lane < tail_lanes
            ch_s = jnp.where(valid, ch, 0.0)      # exact: adds 0 to the sum
            ch_m = jnp.where(valid, ch, -jnp.inf)  # exact: never wins the max
            psum = ch_s if psum is None else psum + ch_s
            pmax = ch_m if pmax is None else jnp.maximum(pmax, ch_m)
        if psum is not None:
            sum_acc[...] += psum
            max_acc[...] = jnp.maximum(max_acc[...], pmax)

    def kernel(x_ref, o_ref, sum_acc, max_acc):
        k = pl.program_id(1)  # H*W reduction axis — last grid axis.

        @pl.when(k == 0)
        def _init():
            sum_acc[...] = jnp.zeros_like(sum_acc)
            max_acc[...] = jnp.full_like(max_acc, -jnp.inf)

        if hw_steps == 1:
            # Single reduction step: just the (possibly ragged) block.
            _accum(x_ref, sum_acc, max_acc, tail_full, tail_rem)
        elif hw_valid_last == tile_hw:
            # H*W divides evenly: every block is full; no masking anywhere.
            _accum(x_ref, sum_acc, max_acc, n_chunks, 0)
        else:
            last = pl.num_programs(1) - 1

            @pl.when(k < last)
            def _full_block():
                _accum(x_ref, sum_acc, max_acc, n_chunks, 0)

            @pl.when(k == last)
            def _ragged_block():
                _accum(x_ref, sum_acc, max_acc, tail_full, tail_rem)

        @pl.when(k == pl.num_programs(1) - 1)
        def _finalize():
            # One 128-wide cross-lane (XLU) reduce per row tile, then epilogue.
            row_sum = jnp.sum(sum_acc[...], axis=-1, keepdims=True)  # (tile_bc, 1)
            row_max = jnp.max(max_acc[...], axis=-1, keepdims=True)  # (tile_bc, 1)
            avg = jnp.maximum(row_sum * inv_hw, 0.0)   # ReLU(AdaptiveAvgPool2d(1))
            mx = jnp.maximum(row_max, 0.0)             # ReLU(AdaptiveMaxPool2d(1))
            z = avg + mx                               # z >= 0 -> exp(-z) is safe
            o_ref[...] = (1.0 / (1.0 + jnp.exp(-z))).astype(o_ref.dtype)

    return kernel


@functools.partial(jax.jit, static_argnames=("tile_bc_max", "block_bytes"))
def prompt_enhance_forward(x, *, tile_bc_max=256, block_bytes=8 * 1024 * 1024):
    """x: (B, C, H, W) NCHW (f32 or bf16). Returns (B, C, 1, 1) like the module."""
    B, C, H, W = x.shape
    BC, HW = B * C, H * W
    x2d = x.reshape(BC, HW)

    itemsize = jnp.dtype(x.dtype).itemsize
    sub = {4: 8, 2: 16, 1: 32}.get(itemsize, 8)  # sublane packing per dtype

    # --- Row (B*C) tiling: no wrapper-side padding (Pallas masks boundary rows).
    if BC <= sub:
        tile_bc = BC                                  # block == full dim
    elif BC <= tile_bc_max:
        tile_bc = _round_up(pl.cdiv(BC, 2), sub)      # >=2 row tiles -> both v7x TCs
    else:
        tile_bc = _round_up(tile_bc_max, sub)
    grid_bc = pl.cdiv(BC, tile_bc)

    # --- Reduction (H*W) tiling: multiple of 128 lanes; ~block_bytes per block
    #     (same byte size for bf16 since the target is expressed in bytes).
    hw_ceil = _round_up(HW, _LANES)
    tile_hw = max(_LANES, (block_bytes // (tile_bc * itemsize)) // _LANES * _LANES)
    tile_hw = min(tile_hw, hw_ceil)
    grid_hw = pl.cdiv(HW, tile_hw)
    hw_valid_last = HW - (grid_hw - 1) * tile_hw      # lanes valid in last block

    kernel = _make_kernel(tile_hw=tile_hw, hw_steps=grid_hw,
                          hw_valid_last=hw_valid_last, inv_hw=1.0 / HW)

    out2d = pl.pallas_call(
        kernel,
        out_shape=jax.ShapeDtypeStruct((BC, 1), x.dtype),
        grid_spec=pltpu.PrefetchScalarGridSpec(
            num_scalar_prefetch=0,
            grid=(grid_bc, grid_hw),
            in_specs=[pl.BlockSpec((tile_bc, tile_hw), lambda i, k: (i, k))],
            out_specs=pl.BlockSpec((tile_bc, 1), lambda i, k: (i, 0)),
            scratch_shapes=[
                pltpu.VMEM((tile_bc, _LANES), jnp.float32),  # running sum
                pltpu.VMEM((tile_bc, _LANES), jnp.float32),  # running max
            ],
        ),
        compiler_params=pltpu.CompilerParams(
            dimension_semantics=("parallel", "arbitrary"),
            vmem_limit_bytes=_vmem_limit_bytes(),
        ),
        cost_estimate=pl.CostEstimate(
            flops=2 * BC * HW,
            transcendentals=BC,
            bytes_accessed=BC * HW * itemsize + BC * itemsize,
        ),
    )(x2d)

    return out2d.reshape(B, C, 1, 1)


def _reference(x):
    avg = jnp.maximum(jnp.mean(x, axis=(2, 3), keepdims=True), 0.0)
    mx = jnp.maximum(jnp.max(x, axis=(2, 3), keepdims=True), 0.0)
    return jax.nn.sigmoid(avg + mx)


def _check(out, ref, shape, tag):
    assert out.shape == shape, (tag, out.shape)
    err = float(jnp.max(jnp.abs(out - ref)))
    assert jnp.allclose(out, ref, atol=1e-5, rtol=1e-5), (tag, err)


if __name__ == "__main__":
    root = jax.random.PRNGKey(0)
    k1, k2, k3, k4 = jax.random.split(root, 4)

    # 1) Primary: shape consistent with the module (in_planes=8 -> C=8).
    #    BC=16 -> two row tiles; HW=256 -> single full reduction step.
    x1 = jax.random.normal(k1, (2, 8, 16, 16), dtype=jnp.float32)
    out1 = jax.block_until_ready(prompt_enhance_forward(x1))
    _check(out1, _reference(x1), (2, 8, 1, 1), "t1")

    # 2) Ragged on both axes, no padding anywhere: BC=30 (partial row block),
    #    HW=2500 (masked 68-lane tail inside the kernel).
    x2 = jax.random.normal(k2, (3, 10, 50, 50), dtype=jnp.float32)
    out2 = jax.block_until_ready(prompt_enhance_forward(x2))
    _check(out2, _reference(x2), (3, 10, 1, 1), "t2")

    # 3) Multi-step reduction grid (forced small blocks): exercises the
    #    pl.when full-block / ragged-last-block paths across grid steps.
    x3 = jax.random.normal(k3, (2, 8, 60, 60), dtype=jnp.float32)
    out3 = jax.block_until_ready(prompt_enhance_forward(x3, block_bytes=64 * 1024))
    _check(out3, _reference(x3), (2, 8, 1, 1), "t3")

    # 4) Long chunk loop (50 chunks): exercises the lax.fori_loop grouped path.
    x4 = jax.random.normal(k4, (1, 8, 80, 80), dtype=jnp.float32)
    out4 = jax.block_until_ready(prompt_enhance_forward(x4))
    _check(out4, _reference(x4), (1, 8, 1, 1), "t4")

    print("KERNEL_OK")
</pallas_src>

<mosaic_0001>
module attributes {stable_mosaic.version = 11 : i64} {
  func.func @kernel(%arg0: i32, %arg1: i32, %arg2: memref<8x256xf32, #tpu.memory_space<vmem>>, %arg3: memref<8x1xf32, #tpu.memory_space<vmem>>, %arg4: memref<8x128xf32, #tpu.memory_space<vmem>>, %arg5: memref<8x128xf32, #tpu.memory_space<vmem>>) attributes {dimension_semantics = [#tpu.dimension_semantics<parallel>, #tpu.dimension_semantics<arbitrary>], iteration_bounds = array<i64: 2, 1>, scalar_prefetch = 0 : i64, scratch_operands = 2 : i64, tpu.core_type = #tpu.core_type<tc>, window_params = [{transform_indices = @transform_0, window_bounds = array<i64: 8, 256>}, {transform_indices = @transform_1, window_bounds = array<i64: 8, 1>}]} {
    %c0_i32 = arith.constant 0 : i32
    %0 = arith.cmpi eq, %arg1, %c0_i32 : i32
    %1 = arith.extui %0 : i1 to i32
    %c0_i32_0 = arith.constant 0 : i32
    %2 = arith.cmpi ne, %1, %c0_i32_0 : i32
    scf.if %2 {
      %cst = arith.constant 0.000000e+00 : f32
      %16 = vector.broadcast %cst : f32 to vector<8x128xf32>
      %c0_13 = arith.constant 0 : index
      %c0_14 = arith.constant 0 : index
      %17 = vector.load %arg4[%c0_13, %c0_14] : memref<8x128xf32, #tpu.memory_space<vmem>>, vector<8x128xf32>
      tpu.vector_store %arg4[%c0_13, %c0_14], %16 {strides = array<i32>} : memref<8x128xf32, #tpu.memory_space<vmem>>, vector<8x128xf32>,
      %cst_15 = arith.constant 0xFF800000 : f32
      %18 = vector.broadcast %cst_15 : f32 to vector<8x128xf32>
      %c0_16 = arith.constant 0 : index
      %c0_17 = arith.constant 0 : index
      %19 = vector.load %arg5[%c0_16, %c0_17] : memref<8x128xf32, #tpu.memory_space<vmem>>, vector<8x128xf32>
      tpu.vector_store %arg5[%c0_16, %c0_17], %18 {strides = array<i32>} : memref<8x128xf32, #tpu.memory_space<vmem>>, vector<8x128xf32>,
    } else {
    }
    %c0 = arith.constant 0 : index
    %c0_1 = arith.constant 0 : index
    %3 = vector.load %arg2[%c0, %c0_1] : memref<8x256xf32, #tpu.memory_space<vmem>>, vector<8x128xf32>
    %c0_2 = arith.constant 0 : index
    %c128 = arith.constant 128 : index
    %4 = vector.load %arg2[%c0_2, %c128] : memref<8x256xf32, #tpu.memory_space<vmem>>, vector<8x128xf32>
    %5 = arith.addf %3, %4 : vector<8x128xf32>
    %6 = arith.maximumf %3, %4 : vector<8x128xf32>
    %c0_3 = arith.constant 0 : index
    %c0_4 = arith.constant 0 : index
    %7 = vector.load %arg4[%c0_3, %c0_4] : memref<8x128xf32, #tpu.memory_space<vmem>>, vector<8x128xf32>
    %8 = arith.addf %7, %5 : vector<8x128xf32>
    %c0_5 = arith.constant 0 : index
    %c0_6 = arith.constant 0 : index
    %9 = vector.load %arg4[%c0_5, %c0_6] : memref<8x128xf32, #tpu.memory_space<vmem>>, vector<8x128xf32>
    tpu.vector_store %arg4[%c0_5, %c0_6], %8 {strides = array<i32>} : memref<8x128xf32, #tpu.memory_space<vmem>>, vector<8x128xf32>,
    %c0_7 = arith.constant 0 : index
    %c0_8 = arith.constant 0 : index
    %10 = vector.load %arg5[%c0_7, %c0_8] : memref<8x128xf32, #tpu.memory_space<vmem>>, vector<8x128xf32>
    %11 = arith.maximumf %10, %6 : vector<8x128xf32>
    %c0_9 = arith.constant 0 : index
    %c0_10 = arith.constant 0 : index
    %12 = vector.load %arg5[%c0_9, %c0_10] : memref<8x128xf32, #tpu.memory_space<vmem>>, vector<8x128xf32>
    tpu.vector_store %arg5[%c0_9, %c0_10], %11 {strides = array<i32>} : memref<8x128xf32, #tpu.memory_space<vmem>>, vector<8x128xf32>,
    %c0_i32_11 = arith.constant 0 : i32
    %13 = arith.cmpi eq, %arg1, %c0_i32_11 : i32
    %14 = arith.extui %13 : i1 to i32
    %c0_i32_12 = arith.constant 0 : i32
    %15 = arith.cmpi ne, %14, %c0_i32_12 : i32
    scf.if %15 {
      %c0_13 = arith.constant 0 : index
      %c0_14 = arith.constant 0 : index
      %16 = vector.load %arg4[%c0_13, %c0_14] : memref<8x128xf32, #tpu.memory_space<vmem>>, vector<8x128xf32>
      %cst = arith.constant dense<0.000000e+00> : vector<8xf32>
      %17 = vector.multi_reduction <add>, %16, %cst [1] : vector<8x128xf32> to vector<8xf32>
      %18 = vector.shape_cast %17 : vector<8xf32> to vector<8x1xf32>
      %c0_15 = arith.constant 0 : index
      %c0_16 = arith.constant 0 : index
      %19 = vector.load %arg5[%c0_15, %c0_16] : memref<8x128xf32, #tpu.memory_space<vmem>>, vector<8x128xf32>
      %cst_17 = arith.constant dense<0xFF800000> : vector<8xf32>
      %20 = vector.multi_reduction <maximumf>, %19, %cst_17 [1] : vector<8x128xf32> to vector<8xf32>
      %21 = vector.shape_cast %20 : vector<8xf32> to vector<8x1xf32>
      %cst_18 = arith.constant 3.906250e-03 : f32
      %22 = vector.broadcast %cst_18 : f32 to vector<8x1xf32>
      %23 = arith.mulf %18, %22 : vector<8x1xf32>
      %cst_19 = arith.constant 0.000000e+00 : f32
      %24 = vector.broadcast %cst_19 : f32 to vector<8x1xf32>
      %25 = arith.maximumf %23, %24 : vector<8x1xf32>
      %cst_20 = arith.constant 0.000000e+00 : f32
      %26 = vector.broadcast %cst_20 : f32 to vector<8x1xf32>
      %27 = arith.maximumf %21, %26 : vector<8x1xf32>
      %28 = arith.addf %25, %27 : vector<8x1xf32>
      %cst_21 = arith.constant 0.000000e+00 : f32
      %29 = vector.broadcast %cst_21 : f32 to vector<8x1xf32>
      %30 = arith.subf %29, %28 : vector<8x1xf32>
      %31 = math.exp %30 : vector<8x1xf32>
      %cst_22 = arith.constant 1.000000e+00 : f32
      %32 = vector.broadcast %cst_22 : f32 to vector<8x1xf32>
      %33 = arith.addf %32, %31 : vector<8x1xf32>
      %cst_23 = arith.constant 1.000000e+00 : f32
      %34 = vector.broadcast %cst_23 : f32 to vector<8x1xf32>
      %35 = arith.divf %34, %33 : vector<8x1xf32>
      %c0_24 = arith.constant 0 : index
      %c0_25 = arith.constant 0 : index
      %36 = vector.load %arg3[%c0_24, %c0_25] : memref<8x1xf32, #tpu.memory_space<vmem>>, vector<8x1xf32>
      tpu.vector_store %arg3[%c0_24, %c0_25], %35 {strides = array<i32>} : memref<8x1xf32, #tpu.memory_space<vmem>>, vector<8x1xf32>,
    } else {
    }
    return
  }
  func.func @transform_0(%arg0: i32, %arg1: i32) -> (i32, i32) {
    %c0_i32 = arith.constant 0 : i32
    return %arg0, %arg1 : i32, i32
  }
  func.func @transform_1(%arg0: i32, %arg1: i32) -> (i32, i32) {
    %c0_i32 = arith.constant 0 : i32
    %c0_i32_0 = arith.constant 0 : i32
    return %arg0, %c0_i32 : i32, i32
  }
}

</mosaic_0001>

<bundles_post_ra>
// kernel: prompt_enhance_forward.1
= control target key start
LH: loop header
LB: loop body
LE: loop exit
PB: predicated region body
PF: predicated region fallthrough
CT: control target
= control target key end

     0   :  { %s333_s6 = smov 0   ;;  %s335_s7 = smov 0   ;;  %s370_s0 = inlined_call_operand.vmem [shape: f32[16,256], index: 0, kind: input, shape index: {}]   ;;  %s371_s1 = inlined_call_operand.vmem [shape: f32[16,1], index: 1, kind: output, shape index: {}]  }
   0x1   :  { %s337_s8 = smov 0  }
   0x2 LB: > { %s23_s9 = sadd.s32 1, %s317_s7  ;;  %p264_p0 = scmp.ge.s32.totalorder %s321_s8, 1  ;;  %s321_s8 = sphi %s337_s8, %s11_s8   ;;  %s317_s7 = sphi %s335_s7, %s373_s7   ;;  %s313_s6 = sphi %s333_s6, %s372_s6  }
   0x3   : > { %p25_p1 = scmp.ge.s32.totalorder %s23_s9, 2  ;;  %p106_p2 = scmp.lt.s32.totalorder %s321_s8, 3 }
   0x5   : > { %s375_s9 = smov (%p25_p1, %s23_s9), 0  ;;  %p107_p3 = pnand %p264_p0, %p106_p2 }
   0x6   : > { %p130_p4 = scmp.lt.s32.totalorder (!%p107_p3), %s313_s6, 1 }
   0x7   : > { %110 = sbr.rel (%p107_p3) target bundleno = 177 (0xb1), region = 24 }
   0xc   : > { %s377_s6 = smov (!%p130_p4, %s313_s6), 1  ;;  %vm191_vm2 = vcmask 7168  }
   0xd   : > { %s270_s10 = sshll.u32 %s377_s6, 4  ;;  %s267_s14 = sshll.u32 %s377_s6, 3 }
   0xe   : > { %s137_s13 = scalar_lea.vmem %s370_s0, %s270_s10  ;;  %s142_s17 = scalar_lea.vmem %s371_s1, %s267_s14 }
   0xf   : > { %v149_v0 = vld [vmem:[%s137_s13] sm:$0xff]  ;;  %v150_v1 = vld [vmem:[%s137_s13 + $0x8] sm:$0xff] }
  0x10   : > { %v151_v2 = vadd.f32 %v150_v1, %v149_v0  ;;  %v152_v3 = vmax.f32 %v149_v0, %v150_v1 }
  0x12   : > { %163 = vadd.xlane.f32.xlu0 %v151_v2 }
  0x1a   : > { %166 = vmax.xlane.f32.xlu0 %v152_v3 }
  0x85   : > { %v164_v4 = vpop.xlane.xlu0 %163 }
  0x86   : > { %v168_v5 = vmul.f32 0.00390625, %v164_v4 }
  0x88   : > { %v169_v7 = vmax.f32 %v168_v5, 0.0 }
  0x8d   : > { %v167_v6 = vpop.xlane.xlu0 %166 }
  0x8e   : > { %v170_v8 = vmax.f32 %v167_v6, 0.0 }
  0x90   : > { %v171_v9 = vadd.f32 %v170_v8, %v169_v7 }
  0x92   : > { %v172_v10 = vsub.f32 0.0, %v171_v9 }
  0x94   : > { %v173_v11 = vmul.f32 1.442695, %v172_v10 }
  0x96   : > { %295 = vpow2.f32 %v173_v11 }
  0x9c   : > { %v296_v12 = vpop.eup %295 }
  0x9d   : > { %v175_v13 = vadd.f32 1.0, %v296_v12 }
  0x9f   : > { %297 = vrcp.f32 %v175_v13  ;;  %v187_v17 = vand.u32 2147483648, %v175_v13  ;;  %v185_v19 = vand.u32 2147483647, %v175_v13  ;;  %vm181_vm1 = vweird.f32 %v175_v13 }
  0xa1   : > { %v188_v21 = vor.u32 1.1754944e-38, %v187_v17  ;;  %vm186_vm4 = vcmp.eq.f32.partialorder %v185_v19, 8.507059e+37 }
  0xa5   : > { %v298_v14 = vpop.eup %297 }
  0xa6   : > { %v177_v15 = vmul.f32 %v298_v14, %v175_v13  ;;  %vm182_vm0 = vweird.f32 %v298_v14 }
  0xa7   : > { %vm183_vm3 = vmor %vm181_vm1, %vm182_vm0 }
  0xa8   : > { %v178_v16 = vsub.f32 1.0, %v177_v15 }
  0xaa   : > { %v179_v18 = vmul.f32 %v298_v14, %v178_v16 }
  0xac   : > { %v180_v20 = vadd.f32 %v298_v14, %v179_v18 }
  0xae   : > { %v184_v22 = vsel %vm183_vm3, %v298_v14, %v180_v20 }
  0xaf   : > { %v189_v23 = vsel %vm186_vm4, %v188_v21, %v184_v22 }
  0xb0   : > { %192 = vst.msk [vmem:[%s142_s17] sm:$0xff] %vm191_vm2, %v189_v23 }
  0xb1 PF: > { %s11_s8 = sadd.s32 1, %s321_s8   ;;  %s372_s6 = smov %s317_s7 }
  0xb2   : > { %p8_p5 = scmp.ge.s32.totalorder %s11_s8, 4   ;;  %s373_s7 = smov %s375_s9 }
  0xb4   :  { %10 = sbr.rel (!%p8_p5) target bundleno = 2 (0x2), region = 62 }

</bundles_post_ra>
